<compile_context>
chip_gen: v5e
topology: v5e:2x2
jax: 0.10.0
libtpu: 0.0.40
codegen_flags: <defaults>
</compile_context>

<pallas_src>
import jax
import jax.numpy as jnp
from jax.experimental import pallas as pl
from jax.experimental.pallas import tpu as pltpu

_HIGHEST = jax.lax.Precision.HIGHEST


def mlp_kernel(x_ref, w1_ref, b1_ref, w2_ref, b2_ref, w3_ref, b3_ref, o_ref):
    x = x_ref[...]                                   # (2, TB)  batch on lanes
    w1 = w1_ref[...]                                 # (10, 2)

    # Layer 1 (K=2): VPU broadcast-FMA; keeps the extended (MXU) slot free for layers 2/3.
    h1 = w1[:, 0:1] * x[0:1, :] + w1[:, 1:2] * x[1:2, :] + b1_ref[...]
    h1 = jnp.maximum(h1, 0.0)                        # (10, TB)

    # Layer 2 (10x10) on the MXU with full-f32 accumulation.
    h2 = jnp.dot(w2_ref[...], h1, preferred_element_type=jnp.float32,
                 precision=_HIGHEST) + b2_ref[...]
    h2 = jnp.maximum(h2, 0.0)                        # (10, TB)

    # Layer 3 (10 -> 1) also on the MXU: sheds the VPU multiply + XLU reduce (review item).
    out = jnp.dot(w3_ref[...], h2, preferred_element_type=jnp.float32,
                  precision=_HIGHEST) + b3_ref[...]
    o_ref[...] = out.astype(o_ref.dtype)             # (1, TB) lane-dense store


def _cdiv(a, b):
    return -(-a // b)


def _round_up(a, b):
    return _cdiv(a, b) * b


# Max lanes per batch tile. Working set per lane (f32): padded (8,TB) x block + padded (8,TB)
# out block, both double-buffered (~64+64 B), plus ~2-3 live (16,TB) hidden temporaries
# (~128-192 B) => ~300-400 B/lane. 32K lanes keeps everything around 10-12 MiB, well inside a
# 32 MiB scoped VMEM limit on v5e/v6e/v7x; per-step compute (~2-3 us) comfortably amortizes
# the ~0.35 us fixed per-grid-step cost. On 128 MiB parts (v5e/v6e) this could be pushed
# higher with a larger vmem_limit_bytes for a few extra percent.
_TB_MAX = 32 * 1024


def _pick_batch_tile(n):
    """Returns (tile_lanes, padded_batch). Tile is a multiple of 128 lanes."""
    n128 = _round_up(max(n, 1), 128)
    if n128 <= 512:                  # tiny batch: one step; fixed overhead dominates anyway
        return n128, n128
    # >= 2 grid steps so ("parallel",) shards the batch across both v7x TensorCores, while
    # sizing the tile to minimize padding waste.
    steps = max(2, _cdiv(n128, _TB_MAX))
    tb = min(_round_up(_cdiv(n128, steps), 128), _TB_MAX)
    return tb, _round_up(n128, tb)


def circle_model_v(x, params):
    """x: (n, 2) float32 -> (n, 1) float32. Weights in PyTorch-style (in, out) layout."""
    w1, b1, w2, b2, w3, b3 = params
    n = x.shape[0]
    TB, n_pad = _pick_batch_tile(n)

    # Layout plumbing. allow_input_fusion below lets XLA fuse this pad + transpose into the
    # pallas_call operand instead of materializing a separate HBM pass. out.T is a unit-dim
    # transpose and effectively free.
    xT = jnp.pad(x.astype(jnp.float32), ((0, n_pad - n), (0, 0))).T   # (2, n_pad)
    w1T = w1.T                       # (10, 2)
    w2T = w2.T                       # (10, 10)
    w3T = w3.T                       # (1, 10)
    b1c = b1.reshape(10, 1)
    b2c = b2.reshape(10, 1)
    b3c = b3.reshape(1, 1)

    grid = (n_pad // TB,)
    resident = lambda shape: pl.BlockSpec(shape, lambda i: (0, 0))

    out = pl.pallas_call(
        mlp_kernel,
        out_shape=jax.ShapeDtypeStruct((1, n_pad), jnp.float32),
        grid=grid,
        in_specs=[
            pl.BlockSpec((2, TB), lambda i: (0, i)),      # x: pipelined over the batch
            resident(w1T.shape), resident(b1c.shape),     # weights/biases stay VMEM-resident
            resident(w2T.shape), resident(b2c.shape),
            resident(w3T.shape), resident(b3c.shape),
        ],
        out_specs=pl.BlockSpec((1, TB), lambda i: (0, i)),
        compiler_params=pltpu.CompilerParams(
            dimension_semantics=("parallel",),            # shard batch across TCs on v7x
            vmem_limit_bytes=32 * 1024 * 1024,            # safe on v7x's 64 MiB physical VMEM
            allow_input_fusion=[True, False, False, False, False, False, False],
        ),
        cost_estimate=pl.CostEstimate(
            flops=2 * n_pad * (2 * 10 + 10 * 10 + 10 * 1),
            bytes_accessed=n_pad * (2 + 1) * 4 + 151 * 4,
            transcendentals=0,
        ),
    )(xT, w1T, b1c, w2T, b2c, w3T, b3c)

    return out.T[:n]                  # (n, 1)


def init_params(key):
    # Deterministic init mimicking nn.Linear's U(-1/sqrt(fan_in), 1/sqrt(fan_in)).
    keys = jax.random.split(key, 6)

    def linear(kw, kb, fan_in, fan_out):
        bound = 1.0 / jnp.sqrt(fan_in)
        w = jax.random.uniform(kw, (fan_in, fan_out), jnp.float32, -bound, bound)
        b = jax.random.uniform(kb, (1, fan_out), jnp.float32, -bound, bound)
        return w, b

    w1, b1 = linear(keys[0], keys[1], 2, 10)
    w2, b2 = linear(keys[2], keys[3], 10, 10)
    w3, b3 = linear(keys[4], keys[5], 10, 1)
    return (w1, b1, w2, b2, w3, b3)


def reference(x, params):
    # Plain-JAX reference at full f32 matmul precision (so the tolerance check is meaningful).
    w1, b1, w2, b2, w3, b3 = params
    h = jnp.maximum(jnp.dot(x, w1, precision=_HIGHEST) + b1, 0.0)
    h = jnp.maximum(jnp.dot(h, w2, precision=_HIGHEST) + b2, 0.0)
    return jnp.dot(h, w3, precision=_HIGHEST) + b3


if __name__ == "__main__":
    key = jax.random.PRNGKey(0)
    pkey, xkey = jax.random.split(key)
    params = init_params(pkey)

    fwd = jax.jit(circle_model_v)

    # Small input consistent with the module (in_features=2): a batch of 8 coordinates.
    x_small = jax.random.normal(xkey, (8, 2), dtype=jnp.float32)
    out_small = jax.block_until_ready(fwd(x_small, params))
    assert out_small.shape == (8, 1)
    assert jnp.allclose(out_small, reference(x_small, params), atol=1e-5), "mismatch (small)"

    # A non-tile-aligned batch exercises the padding path and the >=2-step grid.
    x_big = jax.random.normal(jax.random.PRNGKey(1), (1000, 2), dtype=jnp.float32)
    out_big = jax.block_until_ready(fwd(x_big, params))
    assert out_big.shape == (1000, 1)
    assert jnp.allclose(out_big, reference(x_big, params), atol=1e-5), "mismatch (padded)"

    print("KERNEL_OK")
</pallas_src>

<mosaic_0001>
module attributes {stable_mosaic.version = 11 : i64} {
  func.func @mlp_kernel(%arg0: i32, %arg1: memref<2x128xf32, #tpu.memory_space<vmem>>, %arg2: memref<10x2xf32, #tpu.memory_space<vmem>>, %arg3: memref<10x1xf32, #tpu.memory_space<vmem>>, %arg4: memref<10x10xf32, #tpu.memory_space<vmem>>, %arg5: memref<10x1xf32, #tpu.memory_space<vmem>>, %arg6: memref<1x10xf32, #tpu.memory_space<vmem>>, %arg7: memref<1x1xf32, #tpu.memory_space<vmem>>, %arg8: memref<1x128xf32, #tpu.memory_space<vmem>>) attributes {dimension_semantics = [#tpu.dimension_semantics<parallel>], iteration_bounds = array<i64: 1>, scalar_prefetch = 0 : i64, scratch_operands = 0 : i64, tpu.core_type = #tpu.core_type<tc>, window_params = [{transform_indices = @transform_0, window_bounds = array<i64: 2, 128>}, {pipeline_mode = #tpu.pipeline_mode<synchronous>, transform_indices = @transform_1, window_bounds = array<i64: 10, 2>}, {pipeline_mode = #tpu.pipeline_mode<synchronous>, transform_indices = @transform_2, window_bounds = array<i64: 10, 1>}, {pipeline_mode = #tpu.pipeline_mode<synchronous>, transform_indices = @transform_3, window_bounds = array<i64: 10, 10>}, {pipeline_mode = #tpu.pipeline_mode<synchronous>, transform_indices = @transform_4, window_bounds = array<i64: 10, 1>}, {pipeline_mode = #tpu.pipeline_mode<synchronous>, transform_indices = @transform_5, window_bounds = array<i64: 1, 10>}, {pipeline_mode = #tpu.pipeline_mode<synchronous>, transform_indices = @transform_6, window_bounds = array<i64: 1, 1>}, {transform_indices = @transform_7, window_bounds = array<i64: 1, 128>}]} {
    %c0 = arith.constant 0 : index
    %c0_0 = arith.constant 0 : index
    %0 = vector.load %arg1[%c0, %c0_0] : memref<2x128xf32, #tpu.memory_space<vmem>>, vector<2x128xf32>
    %c0_1 = arith.constant 0 : index
    %c0_2 = arith.constant 0 : index
    %1 = vector.load %arg2[%c0_1, %c0_2] : memref<10x2xf32, #tpu.memory_space<vmem>>, vector<10x2xf32>
    %2 = vector.extract_strided_slice %1 {offsets = [0, 0], sizes = [10, 1], strides = [1, 1]} : vector<10x2xf32> to vector<10x1xf32>
    %3 = vector.extract_strided_slice %0 {offsets = [0, 0], sizes = [1, 128], strides = [1, 1]} : vector<2x128xf32> to vector<1x128xf32>
    %4 = vector.broadcast %2 : vector<10x1xf32> to vector<10x128xf32>
    %5 = vector.broadcast %3 : vector<1x128xf32> to vector<10x128xf32>
    %6 = arith.mulf %4, %5 : vector<10x128xf32>
    %7 = vector.extract_strided_slice %1 {offsets = [0, 1], sizes = [10, 1], strides = [1, 1]} : vector<10x2xf32> to vector<10x1xf32>
    %8 = vector.extract_strided_slice %0 {offsets = [1, 0], sizes = [1, 128], strides = [1, 1]} : vector<2x128xf32> to vector<1x128xf32>
    %9 = vector.broadcast %7 : vector<10x1xf32> to vector<10x128xf32>
    %10 = vector.broadcast %8 : vector<1x128xf32> to vector<10x128xf32>
    %11 = arith.mulf %9, %10 : vector<10x128xf32>
    %12 = arith.addf %6, %11 : vector<10x128xf32>
    %c0_3 = arith.constant 0 : index
    %c0_4 = arith.constant 0 : index
    %13 = vector.load %arg3[%c0_3, %c0_4] : memref<10x1xf32, #tpu.memory_space<vmem>>, vector<10x1xf32>
    %14 = vector.broadcast %13 : vector<10x1xf32> to vector<10x128xf32>
    %15 = arith.addf %12, %14 : vector<10x128xf32>
    %cst = arith.constant 0.000000e+00 : f32
    %16 = vector.broadcast %cst : f32 to vector<10x128xf32>
    %17 = arith.maximumf %15, %16 : vector<10x128xf32>
    %c0_5 = arith.constant 0 : index
    %c0_6 = arith.constant 0 : index
    %18 = vector.load %arg4[%c0_5, %c0_6] : memref<10x10xf32, #tpu.memory_space<vmem>>, vector<10x10xf32>
    %cst_7 = arith.constant dense<0.000000e+00> : vector<10x128xf32>
    %19 = tpu.matmul %18, %17, %cst_7 {dimension_numbers = #tpu.dot_dimension_numbers<[1], [0], [0], [1], [0, 0, 1, 1], [], []>, precision = #tpu.contract_precision<fp32>} : vector<10x10xf32>, vector<10x128xf32>, vector<10x128xf32> -> vector<10x128xf32>
    %c0_8 = arith.constant 0 : index
    %c0_9 = arith.constant 0 : index
    %20 = vector.load %arg5[%c0_8, %c0_9] : memref<10x1xf32, #tpu.memory_space<vmem>>, vector<10x1xf32>
    %21 = vector.broadcast %20 : vector<10x1xf32> to vector<10x128xf32>
    %22 = arith.addf %19, %21 : vector<10x128xf32>
    %cst_10 = arith.constant 0.000000e+00 : f32
    %23 = vector.broadcast %cst_10 : f32 to vector<10x128xf32>
    %24 = arith.maximumf %22, %23 : vector<10x128xf32>
    %c0_11 = arith.constant 0 : index
    %c0_12 = arith.constant 0 : index
    %25 = vector.load %arg6[%c0_11, %c0_12] : memref<1x10xf32, #tpu.memory_space<vmem>>, vector<1x10xf32>
    %cst_13 = arith.constant dense<0.000000e+00> : vector<1x128xf32>
    %26 = tpu.matmul %25, %24, %cst_13 {dimension_numbers = #tpu.dot_dimension_numbers<[1], [0], [0], [1], [0, 0, 1, 1], [], []>, precision = #tpu.contract_precision<fp32>} : vector<1x10xf32>, vector<10x128xf32>, vector<1x128xf32> -> vector<1x128xf32>
    %c0_14 = arith.constant 0 : index
    %c0_15 = arith.constant 0 : index
    %27 = vector.load %arg7[%c0_14, %c0_15] : memref<1x1xf32, #tpu.memory_space<vmem>>, vector<1x1xf32>
    %28 = vector.broadcast %27 : vector<1x1xf32> to vector<1x128xf32>
    %29 = arith.addf %26, %28 : vector<1x128xf32>
    %c0_16 = arith.constant 0 : index
    %c0_17 = arith.constant 0 : index
    %30 = vector.load %arg8[%c0_16, %c0_17] : memref<1x128xf32, #tpu.memory_space<vmem>>, vector<1x128xf32>
    tpu.vector_store %arg8[%c0_16, %c0_17], %29 {strides = array<i32>} : memref<1x128xf32, #tpu.memory_space<vmem>>, vector<1x128xf32>,
    return
  }
  func.func @transform_0(%arg0: i32) -> (i32, i32) {
    %c0_i32 = arith.constant 0 : i32
    %c0_i32_0 = arith.constant 0 : i32
    return %c0_i32, %arg0 : i32, i32
  }
  func.func @transform_1(%arg0: i32) -> (i32, i32) {
    %c0_i32 = arith.constant 0 : i32
    %c0_i32_0 = arith.constant 0 : i32
    %c0_i32_1 = arith.constant 0 : i32
    return %c0_i32, %c0_i32_0 : i32, i32
  }
  func.func @transform_2(%arg0: i32) -> (i32, i32) {
    %c0_i32 = arith.constant 0 : i32
    %c0_i32_0 = arith.constant 0 : i32
    %c0_i32_1 = arith.constant 0 : i32
    return %c0_i32, %c0_i32_0 : i32, i32
  }
  func.func @transform_3(%arg0: i32) -> (i32, i32) {
    %c0_i32 = arith.constant 0 : i32
    %c0_i32_0 = arith.constant 0 : i32
    %c0_i32_1 = arith.constant 0 : i32
    return %c0_i32, %c0_i32_0 : i32, i32
  }
  func.func @transform_4(%arg0: i32) -> (i32, i32) {
    %c0_i32 = arith.constant 0 : i32
    %c0_i32_0 = arith.constant 0 : i32
    %c0_i32_1 = arith.constant 0 : i32
    return %c0_i32, %c0_i32_0 : i32, i32
  }
  func.func @transform_5(%arg0: i32) -> (i32, i32) {
    %c0_i32 = arith.constant 0 : i32
    %c0_i32_0 = arith.constant 0 : i32
    %c0_i32_1 = arith.constant 0 : i32
    return %c0_i32, %c0_i32_0 : i32, i32
  }
  func.func @transform_6(%arg0: i32) -> (i32, i32) {
    %c0_i32 = arith.constant 0 : i32
    %c0_i32_0 = arith.constant 0 : i32
    %c0_i32_1 = arith.constant 0 : i32
    return %c0_i32, %c0_i32_0 : i32, i32
  }
  func.func @transform_7(%arg0: i32) -> (i32, i32) {
    %c0_i32 = arith.constant 0 : i32
    %c0_i32_0 = arith.constant 0 : i32
    return %c0_i32, %arg0 : i32, i32
  }
}

</mosaic_0001>

<bundles_post_ra>
// kernel: circle_model_v.2
= control target key start
LH: loop header
LB: loop body
LE: loop exit
PB: predicated region body
PF: predicated region fallthrough
CT: control target
= control target key end

     0   :  { %s584_s0 = inlined_call_operand.vmem [shape: f32[10,2], index: 0, kind: input, shape index: {}]   ;;  %s585_s1 = inlined_call_operand.vmem [shape: f32[10,1], index: 1, kind: input, shape index: {}]   ;;  %s586_s2 = inlined_call_operand.vmem [shape: f32[10,10], index: 2, kind: input, shape index: {}]   ;;  %s587_s3 = inlined_call_operand.vmem [shape: f32[10,1], index: 3, kind: input, shape index: {}]   ;;  %s588_s4 = inlined_call_operand.vmem [shape: f32[1,10], index: 4, kind: input, shape index: {}]   ;;  %s589_s5 = inlined_call_operand.<no memory space> [shape: f32[1,1], index: 5, kind: input, shape index: {}]   ;;  %s590_s6 = inlined_call_operand.vmem [shape: f32[8,2], index: 6, kind: input, shape index: {}]   ;;  %s591_s7 = inlined_call_operand.<no memory space> [shape: f32[], index: 7, kind: input, shape index: {}]   ;;  %s592_s8 = inlined_call_operand.vmem [shape: f32[1,128], index: 8, kind: output, shape index: {}]  }
   0x1   :  { %v13_v0 = vstv %s591_s7  ;;  %v14_v1 = vstv %s589_s5 }
   0x2   :  { %15 = vst [vmem:[#allocation7] sm:$0x1] %v14_v1 }
   0x3   :  { %v46_v2 = vld [vmem:[%s584_s0 + $0x8] sm:$0x3]  ;;  %v45_v3 = vld [vmem:[%s584_s0] sm:$0xff]  ;;  %v493_v4 = vmov 0   ;;  %v494_v7 = vmov 1   ;;  %v31_v9 = vlaneseq  ;;  %vm103_vm2 = vcmask 80896  }
   0x4   :  { %488 = vset.pattern.permute.xlu1 %v493_v4  ;;  %486 = vset.pattern.permute.xlu0 %v493_v4  ;;  %v74_v5 = vld [vmem:[%s585_s1 + $0x8] sm:$0x3]  ;;  %v73_v6 = vld [vmem:[%s585_s1] sm:$0xff]  ;;  %vm110_vm3 = vcmask 1041408  }
   0x5   :  { %54 = vperm.xlu0 %486, %v46_v2   ;;  %49 = vperm.xlu1 %488, %v45_v3   ;;  %v91_v8 = vld [vmem:[%s587_s3] sm:$0xff]  ;;  %v32_v10 = vshrl.u32 %v31_v9, 7  ;;  %v37_v11 = vand.u32 127, %v31_v9  ;;  %v90_v24 = vld [vmem:[%s586_s2 + $0x8] sm:$0x3] }
   0x6   :  { %490 = vset.pattern.permute.xlu2 %v493_v4  ;;  %v30_v12 = vld [vmem:[%s590_s6] sm:$0x3]  ;;  %v108_v28 = vsel %vm103_vm2, %v90_v24, 0  ;;  %v92_v44 = vld [vmem:[%s587_s3 + $0x8] sm:$0x3] }
   0x7   :  { %82 = vperm.xlu2 %490, %v74_v5   ;;  %vm34_vm0 = vcmp.lt.s32.totalorder %v32_v10, 2  ;;  %vm39_vm1 = vcmp.lt.s32.totalorder %v37_v11, 8  ;;  %v89_v15 = vld [vmem:[%s586_s2] sm:$0xff]  ;;  %v140_v36 = vand.u32 4294901760, %v108_v28 }
   0x8   :  { %v35_v13 = vsel %vm34_vm0, %v30_v12, %v13_v0  ;;  %v105_v18 = vsel %vm103_vm2, %v89_v15, 0  ;;  %v306_v9 = vld [vmem:[%s588_s4] sm:$0x1] }
   0x9   :  { %v40_v14 = vsel %vm39_vm1, %v35_v13, %v13_v0  ;;  %v132_v21 = vand.u32 4294901760, %v105_v18  ;;  %v141_v43 = vsub.f32 %v108_v28, %v140_v36  ;;  %v315_v12 = vsel %vm103_vm2, %v306_v9, 0 }
   0xa   :  { %43 = vst [vmem:[#allocation8] sm:$0x3] %v40_v14 }
   0xb   :  { %v133_v25 = vsub.f32 %v105_v18, %v132_v21  ;;  %v142_v50 = vand.u32 4294901760, %v141_v43 }
   0xd   :  { %487 = vset.pattern.permute.xlu0 %v494_v7  ;;  %489 = vset.pattern.permute.xlu1 %v494_v7  ;;  %v134_v35 = vand.u32 4294901760, %v133_v25  ;;  %v143_v54 = vsub.f32 %v141_v43, %v142_v50 }
   0xe   :  { %65 = vperm.xlu0 %487, %v46_v2   ;;  %61 = vperm.xlu1 %489, %v45_v3  }
   0xf   :  { %77 = vperm.xlu2 %490, %v73_v6   ;;  %v135_v42 = vsub.f32 %v133_v25, %v134_v35  ;;  %v144_v58 = vand.u32 4294901760, %v143_v54 }
  0x11   :  { %v44_v20 = vld [vmem:[#allocation8] sm:$0x3]  ;;  %v136_v48 = vand.u32 4294901760, %v135_v42 }
  0x12   :  { %v57_v22 = vperm.slane %v44_v20, 0  ;;  %v68_v23 = vperm.slane %v44_v20, 1 }
  0x16   :  { %491 = vset.pattern.permute.xlu1 %v493_v4  ;;  %492 = vset.pattern.permute.xlu0 %v493_v4 }
  0x17   :  { %95 = vperm.xlu2 %490, %v91_v8   ;;  %100 = vperm.xlu1 %491, %v92_v44  }
  0x61   :  { %v83_v19 = vpop.permute.xlu2 %82 }
  0x69   :  { %v78_v37 = vpop.permute.xlu2 %77 }
  0x71   :  { %v96_v63 = vpop.permute.xlu2 %95 }
  0x77   :  { %v55_v16 = vpop.permute.xlu0 %54  ;;  %v50_v17 = vpop.permute.xlu1 %49 }
  0x78   :  { %v59_v29 = vmul.f32 %v57_v22, %v55_v16  ;;  %v58_v30 = vmul.f32 %v57_v22, %v50_v17  ;;  %v338_v16 = vand.u32 4294901760, %v315_v12 }
  0x7a   :  { %v339_v22 = vsub.f32 %v315_v12, %v338_v16 }
  0x7c   :  { %v340_v28 = vand.u32 4294901760, %v339_v22 }
  0x80   :  { %v66_v26 = vpop.permute.xlu0 %65  ;;  %v62_v27 = vpop.permute.xlu1 %61 }
  0x81   :  { %v70_v31 = vmul.f32 %v68_v23, %v66_v26  ;;  %v69_v32 = vmul.f32 %v68_v23, %v62_v27  ;;  %v307_v23 = vld [vmem:[#allocation7] sm:$0x1] }
  0x82   :  { %310 = vperm.xlu0 %492, %v307_v23  }
  0x83   :  { %v72_v33 = vadd.f32 %v70_v31, %v59_v29  ;;  %v71_v34 = vadd.f32 %v69_v32, %v58_v30  ;;  %v341_v32 = vsub.f32 %v339_v22, %v340_v28 }
  0x85   :  { %v86_v38 = vadd.f32 %v83_v19, %v72_v33  ;;  %v85_v39 = vadd.f32 %v78_v37, %v71_v34  ;;  %v342_v37 = vand.u32 4294901760, %v341_v32 }
  0x87   :  { %v88_v40 = vmax.f32 %v86_v38, 0.0  ;;  %v87_v41 = vmax.f32 %v85_v39, 0.0 }
  0x89   :  { %v112_v45 = vsel %vm110_vm3, %v88_v40, 0  ;;  %v130_v46 = vand.u32 4294901760, %v87_v41  ;;  %v101_v3 = vpop.permute.xlu1 %100 }
  0x8a   :  { %v128_v47 = vand.u32 4294901760, %v112_v45 }
  0x8b   :  { %v170_v49 = vsub.f32 %v87_v41, %v130_v46 }
  0x8c   :  { %129 = vmatpush.msra.mxu0 %v128_v47  ;;  %230 = vmatpush.msra.mxu3 %v128_v47  ;;  %v164_v51 = vsub.f32 %v112_v45, %v128_v47 }
  0x8d   :  { %v171_v52 = vand.u32 4294901760, %v170_v49 }
  0x8e   :  { %131 = vmatpush.msra.mxu0 %v130_v46  ;;  %200 = vmatpush.msra.mxu2 %v164_v51  ;;  %v165_v53 = vand.u32 4294901760, %v164_v51 }
  0x8f   :  { %232 = vmatpush.msra.mxu3 %v130_v46  ;;  %137 = vmatmul.f32.vlgmr.msra.gmra.mxu0 %v136_v48  ;;  %v172_v56 = vsub.f32 %v170_v49, %v171_v52 }
  0x90   :  { %203 = vmatpush.msra.mxu2 %v170_v49  ;;  %263 = vmatpush.msrb.mxu0 %v165_v53  ;;  %v166_v55 = vsub.f32 %v164_v51, %v165_v53 }
  0x91   :  { %206 = vmatmul.f32.vlgmr.msra.gmra.mxu2 %v133_v25  ;;  %236 = vmatmul.f32.vlgmr.msra.gmra.mxu3 %v134_v35  ;;  %v173_v59 = vand.u32 4294901760, %v172_v56 }
  0x92   :  { %267 = vmatpush.msrb.mxu0 %v171_v52  ;;  %v167_v57 = vand.u32 4294901760, %v166_v55 }
  0x94   :  { %168 = vmatpush.msra.mxu1 %v167_v57 }
  0x96   :  { %174 = vmatpush.msra.mxu1 %v173_v59 }
  0x97   :  { %145 = vmatmul.f32.gmra.mxu0 %v144_v58  ;;  %176 = vmatmul.f32.vlgmr.msra.gmra.mxu1 %v132_v21 }
  0x98   :  { %292 = vmatpush.msrb.mxu1 %v128_v47 }
  0x99   :  { %211 = vmatmul.f32.gmra.mxu2 %v141_v43  ;;  %242 = vmatmul.f32.gmra.mxu3 %v142_v50 }
  0x9a   :  { %294 = vmatpush.msrb.mxu1 %v130_v46 }
  0x9f   :  { %180 = vmatmul.f32.gmra.mxu1 %v140_v36  ;;  %269 = vmatmul.f32.vlgmr.msrb.gmra.mxu0 %v132_v21 }
  0xa7   :  { %273 = vmatmul.f32.gmra.mxu0 %v140_v36  ;;  %296 = vmatmul.f32.vlgmr.msrb.gmra.mxu1 %v132_v21 }
  0xaf   :  { %300 = vmatmul.f32.gmra.mxu1 %v140_v36 }
  0xf4   :  { %v311_v43 = vpop.permute.xlu0 %310 }
  0xf5   :  { %v313_v45 = vperm.slane %v311_v43, 0 }
 0x10c   :  { %v138_v60 = vpop.f32.mrf.mxu0 }
 0x10d   :  { %v139_v0 = vadd.f32 %v138_v60, %v96_v63 }
 0x114   :  { %v146_v61 = vpop.f32.mrf.mxu0  ;;  %v177_v62 = vpop.f32.mrf.mxu1 }
 0x115   :  { %v207_v1 = vpop.f32.mrf.mxu2  ;;  %v178_v2 = vadd.f32 %v177_v62, %v139_v0  ;;  %v237_v4 = vpop.f32.mrf.mxu3  ;;  %v147_v7 = vadd.f32 %v146_v61, %v101_v3 }
 0x117   :  { %v208_v6 = vadd.f32 %v207_v1, %v178_v2 }
 0x119   :  { %v238_v10 = vadd.f32 %v237_v4, %v208_v6 }
 0x11c   :  { %v181_v5 = vpop.f32.mrf.mxu1  ;;  %v270_v8 = vpop.f32.mrf.mxu0 }
 0x11d   :  { %v182_v11 = vadd.f32 %v181_v5, %v147_v7  ;;  %v212_v13 = vpop.f32.mrf.mxu2  ;;  %v271_v14 = vadd.f32 %v270_v8, %v238_v10  ;;  %v243_v19 = vpop.f32.mrf.mxu3 }
 0x11f   :  { %v213_v17 = vadd.f32 %v212_v13, %v182_v11 }
 0x121   :  { %v244_v24 = vadd.f32 %v243_v19, %v213_v17 }
 0x124   :  { %v297_v15 = vpop.f32.mrf.mxu1  ;;  %v274_v20 = vpop.f32.mrf.mxu0 }
 0x125   :  { %v298_v18 = vadd.f32 %v297_v15, %v271_v14  ;;  %v275_v25 = vadd.f32 %v274_v20, %v244_v24 }
 0x127   :  { %v304_v21 = vmax.f32 %v298_v18, 0.0 }
 0x129   :  { %v336_v26 = vand.u32 4294901760, %v304_v21 }
 0x12b   :  { %v368_v31 = vsub.f32 %v304_v21, %v336_v26 }
 0x12c   :  { %v301_v27 = vpop.f32.mrf.mxu1 }
 0x12d   :  { %v302_v29 = vadd.f32 %v301_v27, %v275_v25  ;;  %v369_v36 = vand.u32 4294901760, %v368_v31 }
 0x12f   :  { %v305_v30 = vmax.f32 %v302_v29, 0.0  ;;  %v370_v40 = vsub.f32 %v368_v31, %v369_v36 }
 0x131   :  { %v318_v33 = vsel %vm110_vm3, %v305_v30, 0  ;;  %v371_v42 = vand.u32 4294901760, %v370_v40 }
 0x132   :  { %v334_v34 = vand.u32 4294901760, %v318_v33 }
 0x134   :  { %v362_v35 = vsub.f32 %v318_v33, %v334_v34  ;;  %335 = vmatpush.msrb.mxu2 %v334_v34  ;;  %471 = vmatpush.msra.mxu1 %v334_v34 }
 0x136   :  { %337 = vmatpush.msrb.mxu2 %v336_v26  ;;  %473 = vmatpush.msra.mxu1 %v336_v26  ;;  %v363_v38 = vand.u32 4294901760, %v362_v35 }
 0x137   :  { %475 = vmatmul.f32.vlgmr.msra.gmra.mxu1 %v338_v16  ;;  %343 = vmatmul.f32.vlgmr.msrb.gmra.mxu2 %v342_v37 }
 0x138   :  { %394 = vmatpush.msra.mxu2 %v362_v35  ;;  %446 = vmatpush.msra.mxu0 %v363_v38  ;;  %v364_v39 = vsub.f32 %v362_v35, %v363_v38 }
 0x13a   :  { %397 = vmatpush.msra.mxu2 %v368_v31  ;;  %450 = vmatpush.msra.mxu0 %v369_v36  ;;  %v365_v41 = vand.u32 4294901760, %v364_v39 }
 0x13b   :  { %452 = vmatmul.f32.vlgmr.msra.gmra.mxu0 %v338_v16 }
 0x13c   :  { %366 = vmatpush.msrb.mxu3 %v365_v41 }
 0x13e   :  { %372 = vmatpush.msrb.mxu3 %v371_v42 }
 0x13f   :  { %374 = vmatmul.f32.vlgmr.msrb.gmra.mxu3 %v338_v16  ;;  %400 = vmatmul.f32.vlgmr.msra.gmra.mxu2 %v339_v22 }
 0x140   :  { %419 = vmatpush.msra.mxu3 %v334_v34 }
 0x142   :  { %421 = vmatpush.msra.mxu3 %v336_v26 }
 0x147   :  { %425 = vmatmul.f32.vlgmr.msra.gmra.mxu3 %v340_v28 }
 0x1b4   :  { %v476_v54 = vpop.f32.mrf.mxu1 }
 0x1b8   :  { %v453_v52 = vpop.f32.mrf.mxu0 }
 0x1ba   :  { %v344_v44 = vpop.f32.mrf.mxu2 }
 0x1bb   :  { %v345_v46 = vadd.f32 %v344_v44, %v313_v45 }
 0x1c2   :  { %v375_v47 = vpop.f32.mrf.mxu3  ;;  %v401_v49 = vpop.f32.mrf.mxu2 }
 0x1c3   :  { %v376_v48 = vadd.f32 %v375_v47, %v345_v46 }
 0x1c5   :  { %v402_v50 = vadd.f32 %v401_v49, %v376_v48 }
 0x1ca   :  { %v426_v51 = vpop.f32.mrf.mxu3 }
 0x1cb   :  { %v427_v53 = vadd.f32 %v426_v51, %v402_v50 }
 0x1cd   :  { %v454_v55 = vadd.f32 %v453_v52, %v427_v53 }
 0x1cf   :  { %v477_v56 = vadd.f32 %v476_v54, %v454_v55 }
 0x1d1   :  { %479 = vst [vmem:[%s592_s8] sm:$0x1] %v477_v56 }

</bundles_post_ra>
